<compile_context>
chip_gen: v6e
topology: v6e:2x2x1
jax: 0.10.0
libtpu: 0.0.40
codegen_flags: <defaults>
</compile_context>

<pallas_src>
import functools
import math

import jax
import jax.numpy as jnp
import numpy as np
from jax.experimental import pallas as pl
from jax.experimental.pallas import tpu as pltpu


_NEG_INF = -1e9
_LN_EPS = 1e-12
_VMEM_LIMIT = 48 * 1024 * 1024


def _cparams(n_parallel_axes):
    return pltpu.CompilerParams(
        dimension_semantics=("parallel",) * n_parallel_axes,
        vmem_limit_bytes=_VMEM_LIMIT)


def _tile_and_pad(n, target):
    """Row tile <= target (multiple of 8 when actually tiling) and padded extent."""
    if n <= target:
        return n, n
    for t in range(target, 7, -8):
        if n % t == 0:
            return t, n
    padded = ((n + target - 1) // target) * target
    return target, padded


# ---------------------------------------------------------------------------
# Shared numerics (used by the Pallas kernels AND the pure-JAX reference so
# both paths quantize at exactly the same op boundaries).
# ---------------------------------------------------------------------------
def _ln_f32(h, gamma, beta, eps=_LN_EPS):
    mu = jnp.mean(h, axis=-1, keepdims=True)
    d = h - mu
    var = jnp.mean(d * d, axis=-1, keepdims=True)
    return (d * jax.lax.rsqrt(var + eps) * gamma.astype(jnp.float32)
            + beta.astype(jnp.float32))


# ---------------------------------------------------------------------------
# Pallas kernels
# ---------------------------------------------------------------------------
def _proj_kernel(x_ref, w_ref, b_ref, *o_refs):
    # x @ [W_0 | W_1 | ...] + b, split into len(o_refs) equal chunks in-kernel.
    acc = jnp.dot(x_ref[...], w_ref[...], preferred_element_type=jnp.float32)
    acc = acc + b_ref[...]
    d = acc.shape[-1] // len(o_refs)
    for i, o_ref in enumerate(o_refs):
        o_ref[...] = acc[:, i * d:(i + 1) * d].astype(o_ref.dtype)


def _ffn_ln_kernel(x_ref, w1_ref, b1_ref, w2_ref, b2_ref, g_ref, b_ref, o_ref, *, eps):
    # LN(x + W2 . gelu(W1 . x + b1) + b2)  -- residual + LN fused in the epilogue.
    x32 = x_ref[...].astype(jnp.float32)
    h = jnp.dot(x_ref[...], w1_ref[...], preferred_element_type=jnp.float32) + b1_ref[...]
    # TODO(synk): PyTorch nn.GELU default is exact erf; tanh approximation used here.
    h = jax.nn.gelu(h, approximate=True)
    y = jnp.dot(h.astype(x_ref.dtype), w2_ref[...],
                preferred_element_type=jnp.float32) + b2_ref[...]
    o_ref[...] = _ln_f32(x32 + y, g_ref[...], b_ref[...], eps).astype(o_ref.dtype)


def _embed_ln_kernel(w_ref, p_ref, t_ref, g_ref, b_ref, o_ref, *, eps):
    h = (w_ref[...].astype(jnp.float32) + p_ref[...].astype(jnp.float32)
         + t_ref[...].astype(jnp.float32))
    o_ref[...] = _ln_f32(h, g_ref[...], b_ref[...], eps).astype(o_ref.dtype)


def _attn_proj_body(q_ref, k_ref, v_ref, km_ref, wo_ref, bo_ref, *, scale, causal, tq):
    # Scaled-dot-product attention + masked softmax + Wo projection.
    # Masks are built in-register: no (B,Sq,Sk) bias tensor ever hits HBM.
    # TODO(synk): single attention head; K/V are not Sk-tiled (flash-style online
    # softmax would be needed for very long memory sequences).
    q = q_ref[...] * scale                                           # (tq, d)
    s = jax.lax.dot_general(q, k_ref[...], (((1,), (1,)), ((), ())),
                            preferred_element_type=jnp.float32)      # (tq, sk)
    s = s + (1.0 - km_ref[...].astype(jnp.float32)) * _NEG_INF       # key-padding mask
    if causal:
        row = pl.program_id(1) * tq + jax.lax.broadcasted_iota(jnp.int32, s.shape, 0)
        col = jax.lax.broadcasted_iota(jnp.int32, s.shape, 1)
        s = s + jnp.where(col > row, _NEG_INF, 0.0)
    m = jnp.max(s, axis=-1, keepdims=True)
    p = jnp.exp(s - m)
    l = jnp.sum(p, axis=-1, keepdims=True)
    ctx = jnp.dot(p.astype(v_ref.dtype), v_ref[...], preferred_element_type=jnp.float32)
    ctx = ctx * pl.reciprocal(l, approx=True)                        # EUP, off the VALU
    return jnp.dot(ctx.astype(wo_ref.dtype), wo_ref[...],
                   preferred_element_type=jnp.float32) + bo_ref[...]  # (tq, d) f32


def _attn_proj_ln_kernel(q_ref, k_ref, v_ref, km_ref, res_ref, wo_ref, bo_ref,
                         g_ref, b_ref, o_ref, *, scale, causal, tq, eps):
    y = _attn_proj_body(q_ref, k_ref, v_ref, km_ref, wo_ref, bo_ref,
                        scale=scale, causal=causal, tq=tq)
    h = res_ref[...].astype(jnp.float32) + y
    o_ref[...] = _ln_f32(h, g_ref[...], b_ref[...], eps).astype(o_ref.dtype)


def _attn_proj_mask_kernel(q_ref, k_ref, v_ref, km_ref, om_ref, wo_ref, bo_ref,
                           o_ref, *, scale, tq):
    y = _attn_proj_body(q_ref, k_ref, v_ref, km_ref, wo_ref, bo_ref,
                        scale=scale, causal=False, tq=tq)
    o_ref[...] = (y * om_ref[...].astype(jnp.float32)).astype(o_ref.dtype)


# ---------------------------------------------------------------------------
# Pallas op wrappers
# ---------------------------------------------------------------------------
def fused_proj_pallas(x, w, b, n_out=1):
    *lead, din = x.shape
    dtot = w.shape[1]
    dout = dtot // n_out
    rows = int(np.prod(lead))
    x2 = x.reshape(rows, din)
    tr, rows_p = _tile_and_pad(rows, target=256)
    if rows_p != rows:
        x2 = jnp.pad(x2, ((0, rows_p - rows), (0, 0)))
    outs = pl.pallas_call(
        _proj_kernel,
        out_shape=tuple(jax.ShapeDtypeStruct((rows_p, dout), x.dtype) for _ in range(n_out)),
        grid=(rows_p // tr,),
        in_specs=[
            pl.BlockSpec((tr, din), lambda i: (i, 0)),
            # TODO(synk): pipeline_mode=pl.Buffered(1) on the constant weight blocks
            # would halve resident weight VMEM on v7x; bf16 storage already halves it.
            pl.BlockSpec((din, dtot), lambda i: (0, 0)),
            pl.BlockSpec((1, dtot), lambda i: (0, 0)),
        ],
        out_specs=tuple(pl.BlockSpec((tr, dout), lambda i: (i, 0)) for _ in range(n_out)),
        compiler_params=_cparams(1),
    )(x2, w, b.reshape(1, dtot))
    outs = tuple((o[:rows] if rows_p != rows else o).reshape(*lead, dout) for o in outs)
    return outs if n_out > 1 else outs[0]


def ffn_ln_pallas(x, w1, b1, w2, b2, gamma, beta):
    *lead, din = x.shape
    dff = w1.shape[1]
    rows = int(np.prod(lead))
    x2 = x.reshape(rows, din)
    tr, rows_p = _tile_and_pad(rows, target=256)
    if rows_p != rows:
        x2 = jnp.pad(x2, ((0, rows_p - rows), (0, 0)))
    out = pl.pallas_call(
        functools.partial(_ffn_ln_kernel, eps=_LN_EPS),
        out_shape=jax.ShapeDtypeStruct((rows_p, din), x.dtype),
        grid=(rows_p // tr,),
        in_specs=[
            pl.BlockSpec((tr, din), lambda i: (i, 0)),
            pl.BlockSpec((din, dff), lambda i: (0, 0)),
            pl.BlockSpec((1, dff), lambda i: (0, 0)),
            pl.BlockSpec((dff, din), lambda i: (0, 0)),
            pl.BlockSpec((1, din), lambda i: (0, 0)),
            pl.BlockSpec((1, din), lambda i: (0, 0)),
            pl.BlockSpec((1, din), lambda i: (0, 0)),
        ],
        out_specs=pl.BlockSpec((tr, din), lambda i: (i, 0)),
        compiler_params=_cparams(1),
    )(x2, w1, b1.reshape(1, dff), w2, b2.reshape(1, din),
      gamma.reshape(1, din), beta.reshape(1, din))
    if rows_p != rows:
        out = out[:rows]
    return out.reshape(*lead, din)


def embed_ln_pallas(we, pe, te, gamma, beta):
    *lead, d = we.shape
    rows = int(np.prod(lead))
    tr, rows_p = _tile_and_pad(rows, target=512)   # mem-bound: big tiles
    arrs = [we.reshape(rows, d), pe.reshape(rows, d), te.reshape(rows, d)]
    if rows_p != rows:
        arrs = [jnp.pad(a, ((0, rows_p - rows), (0, 0))) for a in arrs]
    out = pl.pallas_call(
        functools.partial(_embed_ln_kernel, eps=_LN_EPS),
        out_shape=jax.ShapeDtypeStruct((rows_p, d), we.dtype),
        grid=(rows_p // tr,),
        in_specs=[pl.BlockSpec((tr, d), lambda i: (i, 0))] * 3
                 + [pl.BlockSpec((1, d), lambda i: (0, 0))] * 2,
        out_specs=pl.BlockSpec((tr, d), lambda i: (i, 0)),
        compiler_params=_cparams(1),
    )(*arrs, gamma.reshape(1, d), beta.reshape(1, d))
    if rows_p != rows:
        out = out[:rows]
    return out.reshape(*lead, d)


def attn_proj_ln_pallas(q, k, v, key_mask, res, wo, bo, gamma, beta, causal=False):
    bsz, sq, d = q.shape
    sk = k.shape[1]
    scale = 1.0 / math.sqrt(d)
    tq, sq_p = _tile_and_pad(sq, target=256)
    if sq_p != sq:
        pad = ((0, 0), (0, sq_p - sq), (0, 0))
        q = jnp.pad(q, pad)
        res = jnp.pad(res, pad)
    km = key_mask.astype(jnp.float32).reshape(bsz, 1, sk)
    out = pl.pallas_call(
        functools.partial(_attn_proj_ln_kernel, scale=scale, causal=causal,
                          tq=tq, eps=_LN_EPS),
        out_shape=jax.ShapeDtypeStruct((bsz, sq_p, d), q.dtype),
        grid=(bsz, sq_p // tq),
        in_specs=[
            pl.BlockSpec((None, tq, d), lambda bi, qi: (bi, qi, 0)),   # q tile
            pl.BlockSpec((None, sk, d), lambda bi, qi: (bi, 0, 0)),    # full K
            pl.BlockSpec((None, sk, d), lambda bi, qi: (bi, 0, 0)),    # full V
            pl.BlockSpec((None, 1, sk), lambda bi, qi: (bi, 0, 0)),    # key mask
            pl.BlockSpec((None, tq, d), lambda bi, qi: (bi, qi, 0)),   # residual
            pl.BlockSpec((d, d), lambda bi, qi: (0, 0)),               # Wo
            pl.BlockSpec((1, d), lambda bi, qi: (0, 0)),               # bo
            pl.BlockSpec((1, d), lambda bi, qi: (0, 0)),               # gamma
            pl.BlockSpec((1, d), lambda bi, qi: (0, 0)),               # beta
        ],
        out_specs=pl.BlockSpec((None, tq, d), lambda bi, qi: (bi, qi, 0)),
        compiler_params=_cparams(2),
    )(q, k, v, km, res, wo, bo.reshape(1, d), gamma.reshape(1, d), beta.reshape(1, d))
    if sq_p != sq:
        out = out[:, :sq]
    return out


def attn_proj_mask_pallas(q, k, v, key_mask, output_mask, wo, bo):
    bsz, sq, d = q.shape
    sk = k.shape[1]
    scale = 1.0 / math.sqrt(d)
    tq, sq_p = _tile_and_pad(sq, target=256)
    om = output_mask.astype(jnp.float32).reshape(bsz, sq, 1)
    if sq_p != sq:
        q = jnp.pad(q, ((0, 0), (0, sq_p - sq), (0, 0)))
        om = jnp.pad(om, ((0, 0), (0, sq_p - sq), (0, 0)))
    km = key_mask.astype(jnp.float32).reshape(bsz, 1, sk)
    out = pl.pallas_call(
        functools.partial(_attn_proj_mask_kernel, scale=scale, tq=tq),
        out_shape=jax.ShapeDtypeStruct((bsz, sq_p, d), q.dtype),
        grid=(bsz, sq_p // tq),
        in_specs=[
            pl.BlockSpec((None, tq, d), lambda bi, qi: (bi, qi, 0)),
            pl.BlockSpec((None, sk, d), lambda bi, qi: (bi, 0, 0)),
            pl.BlockSpec((None, sk, d), lambda bi, qi: (bi, 0, 0)),
            pl.BlockSpec((None, 1, sk), lambda bi, qi: (bi, 0, 0)),
            pl.BlockSpec((None, tq, 1), lambda bi, qi: (bi, qi, 0)),   # output mask
            pl.BlockSpec((d, d), lambda bi, qi: (0, 0)),
            pl.BlockSpec((1, d), lambda bi, qi: (0, 0)),
        ],
        out_specs=pl.BlockSpec((None, tq, d), lambda bi, qi: (bi, qi, 0)),
        compiler_params=_cparams(2),
    )(q, k, v, km, om, wo, bo.reshape(1, d))
    if sq_p != sq:
        out = out[:, :sq]
    return out


# ---------------------------------------------------------------------------
# Pure-JAX reference ops (mirror the kernels' dtype boundaries exactly)
# ---------------------------------------------------------------------------
def fused_proj_ref(x, w, b, n_out=1):
    y = (jnp.dot(x.astype(jnp.float32), w.astype(jnp.float32))
         + b.astype(jnp.float32)).astype(x.dtype)
    if n_out == 1:
        return y
    return tuple(jnp.split(y, n_out, axis=-1))


def _attn_proj_ref(q, k, v, key_mask, wo, bo, causal):
    dtype = q.dtype
    d = q.shape[-1]
    qs = q * (1.0 / math.sqrt(d))
    s = jnp.einsum("bqd,bkd->bqk", qs.astype(jnp.float32), k.astype(jnp.float32))
    s = s + (1.0 - key_mask.astype(jnp.float32))[:, None, :] * _NEG_INF
    if causal:
        sq, sk = s.shape[1], s.shape[2]
        row = jnp.arange(sq)[:, None]
        col = jnp.arange(sk)[None, :]
        s = s + jnp.where(col > row, _NEG_INF, 0.0)[None]
    m = jnp.max(s, axis=-1, keepdims=True)
    p = jnp.exp(s - m)
    l = jnp.sum(p, axis=-1, keepdims=True)
    ctx = jnp.einsum("bqk,bkd->bqd", p.astype(dtype).astype(jnp.float32),
                     v.astype(jnp.float32)) / l
    return jnp.einsum("bqd,de->bqe", ctx.astype(dtype).astype(jnp.float32),
                      wo.astype(jnp.float32)) + bo.astype(jnp.float32)


def attn_proj_ln_ref(q, k, v, key_mask, res, wo, bo, gamma, beta, causal=False):
    y = _attn_proj_ref(q, k, v, key_mask, wo, bo, causal)
    return _ln_f32(res.astype(jnp.float32) + y, gamma, beta).astype(q.dtype)


def attn_proj_mask_ref(q, k, v, key_mask, output_mask, wo, bo):
    y = _attn_proj_ref(q, k, v, key_mask, wo, bo, False)
    return (y * output_mask.astype(jnp.float32)[..., None]).astype(q.dtype)


def ffn_ln_ref(x, w1, b1, w2, b2, gamma, beta):
    h = jnp.dot(x.astype(jnp.float32), w1.astype(jnp.float32)) + b1.astype(jnp.float32)
    h = jax.nn.gelu(h, approximate=True)
    y = (jnp.dot(h.astype(x.dtype).astype(jnp.float32), w2.astype(jnp.float32))
         + b2.astype(jnp.float32))
    return _ln_f32(x.astype(jnp.float32) + y, gamma, beta).astype(x.dtype)


def embed_ln_ref(we, pe, te, gamma, beta):
    h = (we.astype(jnp.float32) + pe.astype(jnp.float32) + te.astype(jnp.float32))
    return _ln_f32(h, gamma, beta).astype(we.dtype)


PALLAS_OPS = dict(proj=fused_proj_pallas, attn_ln=attn_proj_ln_pallas,
                  attn_mask=attn_proj_mask_pallas, ffn_ln=ffn_ln_pallas,
                  embed_ln=embed_ln_pallas)
REF_OPS = dict(proj=fused_proj_ref, attn_ln=attn_proj_ln_ref,
               attn_mask=attn_proj_mask_ref, ffn_ln=ffn_ln_ref,
               embed_ln=embed_ln_ref)


# ---------------------------------------------------------------------------
# Model (eval-mode forward; dropout is identity)
# ---------------------------------------------------------------------------
def bert_embeddings(ops, token_ids, type_ids, p):
    # TODO(synk): embedding row-gather stays in plain JAX (jnp.take); a Pallas
    # gather would need per-row DMA and is not worthwhile at these sizes.
    b, s = token_ids.shape
    d = p["word"].shape[1]
    we = jnp.take(p["word"], token_ids, axis=0)
    pe = jnp.broadcast_to(p["pos"][None, :s, :], (b, s, d))
    te = jnp.take(p["type"], type_ids, axis=0)
    return ops["embed_ln"](we, pe, te, p["ln_g"], p["ln_b"])


def encoder_layer(ops, x, src_key_mask, p):
    a = p["attn"]
    q, k, v = ops["proj"](x, a["Wqkv"], a["bqkv"], 3)
    x = ops["attn_ln"](q, k, v, src_key_mask, x, a["Wo"], a["bo"],
                       p["ln1_g"], p["ln1_b"], causal=False)
    return ops["ffn_ln"](x, p["ffn_W1"], p["ffn_b1"], p["ffn_W2"], p["ffn_b2"],
                         p["ln2_g"], p["ln2_b"])


def encode(ops, src, src_mask, p):
    x = bert_embeddings(ops, src, jnp.zeros_like(src), p["emb"])
    for layer in p["layers"]:
        x = encoder_layer(ops, x, src_mask, layer)
    return x


def memory_module(ops, hidden, text, type_ids, memory_mask, output_mask, p):
    a = p["attn"]
    kv_in = bert_embeddings(ops, text, type_ids, p["emb"])
    q = ops["proj"](hidden, a["Wq"], a["bq"], 1)
    k, v = ops["proj"](kv_in, a["Wkv"], a["bkv"], 2)
    return ops["attn_mask"](q, k, v, memory_mask, output_mask, a["Wo"], a["bo"])


def decoder_layer(ops, y, hidden, tgt_key_mask, src_key_mask, p):
    sa, ca = p["self"], p["cross"]
    q, k, v = ops["proj"](y, sa["Wqkv"], sa["bqkv"], 3)
    y = ops["attn_ln"](q, k, v, tgt_key_mask, y, sa["Wo"], sa["bo"],
                       p["ln1_g"], p["ln1_b"], causal=True)
    q = ops["proj"](y, ca["Wq"], ca["bq"], 1)
    k, v = ops["proj"](hidden, ca["Wkv"], ca["bkv"], 2)
    y = ops["attn_ln"](q, k, v, src_key_mask, y, ca["Wo"], ca["bo"],
                       p["ln2_g"], p["ln2_b"], causal=False)
    return ops["ffn_ln"](y, p["ffn_W1"], p["ffn_b1"], p["ffn_W2"], p["ffn_b2"],
                         p["ln3_g"], p["ln3_b"])


def decode(ops, hidden, src_mask, tgt, tgt_mask, emb_params, p):
    # tgt_embed = bert.embeddings (shared with the encoder), as in the module.
    # TODO(synk): tgt_mask is decomposed into (causal-in-kernel, (B,S_tgt) key
    # padding mask); an arbitrary dense (B,Sq,Sk) tgt mask would need a bias path.
    y = bert_embeddings(ops, tgt, jnp.zeros_like(tgt), emb_params)
    for layer in p["layers"]:
        y = decoder_layer(ops, y, hidden, tgt_mask, src_mask, layer)
    return y


def decoder_two_memory_bert_encoder_decoder(
        ops, params, src, tgt, src_mask, tgt_mask,
        pos_text, pos_type, pos_memory_mask, pos_output_mask,
        dep_text, dep_type, dep_memory_mask, dep_output_mask,
        return_hidden=False):
    hidden = encode(ops, src, src_mask, params["encoder"])
    pos_output = memory_module(ops, hidden, pos_text, pos_type,
                               pos_memory_mask, pos_output_mask, params["pos_memory"])
    dep_output = memory_module(ops, hidden, dep_text, dep_type,
                               dep_memory_mask, dep_output_mask, params["dep_memory"])
    memory = jnp.concatenate([pos_output, dep_output], axis=-1)
    # TODO(synk): self.generator exists on the module but is not called in forward().
    output = decode(ops, hidden, src_mask, tgt, tgt_mask,
                    params["encoder"]["emb"], params["decoder"])
    if return_hidden:
        return output, memory, hidden
    return output, memory


# ---------------------------------------------------------------------------
# Parameter init (weights stored in the streamed dtype, e.g. bf16)
# ---------------------------------------------------------------------------
def _dense(key, din, dout, dtype, scale=0.02):
    return (jax.random.normal(key, (din, dout), jnp.float32) * scale).astype(dtype)


def _init_emb(key, vocab, type_vocab, max_pos, d, dtype):
    k1, k2, k3 = jax.random.split(key, 3)
    return dict(
        word=(jax.random.normal(k1, (vocab, d), jnp.float32) * 0.02).astype(dtype),
        pos=(jax.random.normal(k2, (max_pos, d), jnp.float32) * 0.02).astype(dtype),
        type=(jax.random.normal(k3, (type_vocab, d), jnp.float32) * 0.02).astype(dtype),
        ln_g=jnp.ones((d,), dtype), ln_b=jnp.zeros((d,), dtype))


def _init_self_attn(key, d, dtype):
    kq, ko = jax.random.split(key)
    return dict(Wqkv=_dense(kq, d, 3 * d, dtype), bqkv=jnp.zeros((3 * d,), dtype),
                Wo=_dense(ko, d, d, dtype), bo=jnp.zeros((d,), dtype))


def _init_cross_attn(key, d, dtype):
    kq, kkv, ko = jax.random.split(key, 3)
    return dict(Wq=_dense(kq, d, d, dtype), bq=jnp.zeros((d,), dtype),
                Wkv=_dense(kkv, d, 2 * d, dtype), bkv=jnp.zeros((2 * d,), dtype),
                Wo=_dense(ko, d, d, dtype), bo=jnp.zeros((d,), dtype))


def _init_ffn(key, d, ff, dtype):
    k1, k2 = jax.random.split(key)
    return dict(ffn_W1=_dense(k1, d, ff, dtype), ffn_b1=jnp.zeros((ff,), dtype),
                ffn_W2=_dense(k2, ff, d, dtype), ffn_b2=jnp.zeros((d,), dtype))


def _ln_params(d, prefix, dtype):
    return {prefix + "_g": jnp.ones((d,), dtype), prefix + "_b": jnp.zeros((d,), dtype)}


def _init_encoder_layer(key, d, ff, dtype):
    k1, k2 = jax.random.split(key)
    p = {"attn": _init_self_attn(k1, d, dtype)}
    p.update(_ln_params(d, "ln1", dtype))
    p.update(_init_ffn(k2, d, ff, dtype))
    p.update(_ln_params(d, "ln2", dtype))
    return p


def _init_decoder_layer(key, d, ff, dtype):
    k1, k2, k3 = jax.random.split(key, 3)
    p = {"self": _init_self_attn(k1, d, dtype), "cross": _init_cross_attn(k2, d, dtype)}
    p.update(_ln_params(d, "ln1", dtype))
    p.update(_ln_params(d, "ln2", dtype))
    p.update(_init_ffn(k3, d, ff, dtype))
    p.update(_ln_params(d, "ln3", dtype))
    return p


def _init_memory(key, vocab, type_vocab, max_pos, d, dtype):
    k1, k2 = jax.random.split(key)
    return dict(emb=_init_emb(k1, vocab, type_vocab, max_pos, d, dtype),
                attn=_init_cross_attn(k2, d, dtype))


def init_params(key, vocab, type_vocab, max_pos, d, ff, n_enc=1, n_dec=1,
                dtype=jnp.bfloat16):
    keys = jax.random.split(key, 5)
    encoder = dict(emb=_init_emb(keys[0], vocab, type_vocab, max_pos, d, dtype),
                   layers=[_init_encoder_layer(k, d, ff, dtype)
                           for k in jax.random.split(keys[1], n_enc)])
    decoder = dict(layers=[_init_decoder_layer(k, d, ff, dtype)
                           for k in jax.random.split(keys[2], n_dec)])
    return dict(encoder=encoder, decoder=decoder,
                pos_memory=_init_memory(keys[3], vocab, type_vocab, max_pos, d, dtype),
                dep_memory=_init_memory(keys[4], vocab, type_vocab, max_pos, d, dtype))


# ---------------------------------------------------------------------------
# Demo / self-test
# ---------------------------------------------------------------------------
if __name__ == "__main__":
    VOCAB, TYPE_VOCAB, MAX_POS = 64, 4, 32
    B, S_SRC, S_TGT, S_MEM, D, FF = 2, 8, 8, 8, 32, 64
    # TODO(synk): for deployment, D should be a multiple of 128 for lane-dense stores.
    DTYPE = jnp.bfloat16   # streamed dtype: halves HBM traffic, bf16 MXU fast path

    root = jax.random.PRNGKey(0)
    kp, k1, k2, k3, k4, k5, k6 = jax.random.split(root, 7)

    params = init_params(kp, VOCAB, TYPE_VOCAB, MAX_POS, D, FF, dtype=DTYPE)

    src = jax.random.randint(k1, (B, S_SRC), 0, VOCAB, dtype=jnp.int32)
    tgt = jax.random.randint(k2, (B, S_TGT), 0, VOCAB, dtype=jnp.int32)
    pos_text = jax.random.randint(k3, (B, S_MEM), 0, VOCAB, dtype=jnp.int32)
    pos_type = jax.random.randint(k4, (B, S_MEM), 0, TYPE_VOCAB, dtype=jnp.int32)
    dep_text = jax.random.randint(k5, (B, S_MEM), 0, VOCAB, dtype=jnp.int32)
    dep_type = jax.random.randint(k6, (B, S_MEM), 0, TYPE_VOCAB, dtype=jnp.int32)

    src_mask = jnp.ones((B, S_SRC), jnp.float32).at[:, -1].set(0.0)   # pad last pos
    tgt_mask = jnp.ones((B, S_TGT), jnp.float32)   # key-padding part; causal is in-kernel
    pos_memory_mask = jnp.ones((B, S_MEM), jnp.float32).at[:, -2:].set(0.0)
    dep_memory_mask = jnp.ones((B, S_MEM), jnp.float32).at[:, -1:].set(0.0)
    pos_output_mask = jnp.ones((B, S_SRC), jnp.float32)
    dep_output_mask = jnp.ones((B, S_SRC), jnp.float32).at[:, 0].set(0.0)

    args = (src, tgt, src_mask, tgt_mask,
            pos_text, pos_type, pos_memory_mask, pos_output_mask,
            dep_text, dep_type, dep_memory_mask, dep_output_mask)

    output, memory = decoder_two_memory_bert_encoder_decoder(PALLAS_OPS, params, *args)
    output, memory = jax.block_until_ready((output, memory))

    assert output.shape == (B, S_TGT, D)
    assert memory.shape == (B, S_SRC, 2 * D)
    assert bool(jnp.all(jnp.isfinite(output))) and bool(jnp.all(jnp.isfinite(memory)))

    # Cross-check every fused Pallas kernel against a pure-JAX reference forward.
    ref_output, ref_memory = decoder_two_memory_bert_encoder_decoder(REF_OPS, params, *args)
    np.testing.assert_allclose(np.asarray(jnp.asarray(output, jnp.float32)),
                               np.asarray(jnp.asarray(ref_output, jnp.float32)),
                               rtol=2e-2, atol=2e-2)
    np.testing.assert_allclose(np.asarray(jnp.asarray(memory, jnp.float32)),
                               np.asarray(jnp.asarray(ref_memory, jnp.float32)),
                               rtol=2e-2, atol=2e-2)

    print("KERNEL_OK")
</pallas_src>

<mosaic_0001>
module attributes {stable_mosaic.version = 11 : i64} {
  func.func @_embed_ln_kernel(%arg0: i32, %arg1: memref<16x32xbf16, #tpu.memory_space<vmem>>, %arg2: memref<16x32xbf16, #tpu.memory_space<vmem>>, %arg3: memref<16x32xbf16, #tpu.memory_space<vmem>>, %arg4: memref<1x32xbf16, #tpu.memory_space<vmem>>, %arg5: memref<1x32xbf16, #tpu.memory_space<vmem>>, %arg6: memref<16x32xbf16, #tpu.memory_space<vmem>>) attributes {dimension_semantics = [#tpu.dimension_semantics<parallel>], iteration_bounds = array<i64: 1>, scalar_prefetch = 0 : i64, scratch_operands = 0 : i64, tpu.core_type = #tpu.core_type<tc>, window_params = [{transform_indices = @transform_0, window_bounds = array<i64: 16, 32>}, {transform_indices = @transform_1, window_bounds = array<i64: 16, 32>}, {transform_indices = @transform_2, window_bounds = array<i64: 16, 32>}, {pipeline_mode = #tpu.pipeline_mode<synchronous>, transform_indices = @transform_3, window_bounds = array<i64: 1, 32>}, {pipeline_mode = #tpu.pipeline_mode<synchronous>, transform_indices = @transform_4, window_bounds = array<i64: 1, 32>}, {transform_indices = @transform_5, window_bounds = array<i64: 16, 32>}]} {
    %c0 = arith.constant 0 : index
    %c0_0 = arith.constant 0 : index
    %0 = vector.load %arg1[%c0, %c0_0] : memref<16x32xbf16, #tpu.memory_space<vmem>>, vector<16x32xbf16>
    %1 = arith.extf %0 : vector<16x32xbf16> to vector<16x32xf32>
    %c0_1 = arith.constant 0 : index
    %c0_2 = arith.constant 0 : index
    %2 = vector.load %arg2[%c0_1, %c0_2] : memref<16x32xbf16, #tpu.memory_space<vmem>>, vector<16x32xbf16>
    %3 = arith.extf %2 : vector<16x32xbf16> to vector<16x32xf32>
    %4 = arith.addf %1, %3 : vector<16x32xf32>
    %c0_3 = arith.constant 0 : index
    %c0_4 = arith.constant 0 : index
    %5 = vector.load %arg3[%c0_3, %c0_4] : memref<16x32xbf16, #tpu.memory_space<vmem>>, vector<16x32xbf16>
    %6 = arith.extf %5 : vector<16x32xbf16> to vector<16x32xf32>
    %7 = arith.addf %4, %6 : vector<16x32xf32>
    %c0_5 = arith.constant 0 : index
    %c0_6 = arith.constant 0 : index
    %8 = vector.load %arg4[%c0_5, %c0_6] : memref<1x32xbf16, #tpu.memory_space<vmem>>, vector<1x32xbf16>
    %c0_7 = arith.constant 0 : index
    %c0_8 = arith.constant 0 : index
    %9 = vector.load %arg5[%c0_7, %c0_8] : memref<1x32xbf16, #tpu.memory_space<vmem>>, vector<1x32xbf16>
    %cst = arith.constant dense<0.000000e+00> : vector<16xf32>
    %10 = vector.multi_reduction <add>, %7, %cst [1] : vector<16x32xf32> to vector<16xf32>
    %11 = vector.shape_cast %10 : vector<16xf32> to vector<16x1xf32>
    %cst_9 = arith.constant 3.200000e+01 : f32
    %12 = vector.broadcast %cst_9 : f32 to vector<16x1xf32>
    %13 = arith.divf %11, %12 : vector<16x1xf32>
    %14 = vector.broadcast %13 : vector<16x1xf32> to vector<16x32xf32>
    %15 = arith.subf %7, %14 : vector<16x32xf32>
    %16 = arith.mulf %15, %15 : vector<16x32xf32>
    %cst_10 = arith.constant dense<0.000000e+00> : vector<16xf32>
    %17 = vector.multi_reduction <add>, %16, %cst_10 [1] : vector<16x32xf32> to vector<16xf32>
    %18 = vector.shape_cast %17 : vector<16xf32> to vector<16x1xf32>
    %cst_11 = arith.constant 3.200000e+01 : f32
    %19 = vector.broadcast %cst_11 : f32 to vector<16x1xf32>
    %20 = arith.divf %18, %19 : vector<16x1xf32>
    %cst_12 = arith.constant 9.99999996E-13 : f32
    %21 = vector.broadcast %cst_12 : f32 to vector<16x1xf32>
    %22 = arith.addf %20, %21 : vector<16x1xf32>
    %23 = math.rsqrt %22 : vector<16x1xf32>
    %24 = vector.broadcast %23 : vector<16x1xf32> to vector<16x32xf32>
    %25 = arith.mulf %15, %24 : vector<16x32xf32>
    %26 = arith.extf %8 : vector<1x32xbf16> to vector<1x32xf32>
    %27 = vector.broadcast %26 : vector<1x32xf32> to vector<16x32xf32>
    %28 = arith.mulf %25, %27 : vector<16x32xf32>
    %29 = arith.extf %9 : vector<1x32xbf16> to vector<1x32xf32>
    %30 = vector.broadcast %29 : vector<1x32xf32> to vector<16x32xf32>
    %31 = arith.addf %28, %30 : vector<16x32xf32>
    %32 = arith.truncf %31 : vector<16x32xf32> to vector<16x32xbf16>
    %c0_13 = arith.constant 0 : index
    %c0_14 = arith.constant 0 : index
    %33 = vector.load %arg6[%c0_13, %c0_14] : memref<16x32xbf16, #tpu.memory_space<vmem>>, vector<16x32xbf16>
    tpu.vector_store %arg6[%c0_13, %c0_14], %32 {strides = array<i32>} : memref<16x32xbf16, #tpu.memory_space<vmem>>, vector<16x32xbf16>,
    return
  }
  func.func @transform_0(%arg0: i32) -> (i32, i32) {
    %c0_i32 = arith.constant 0 : i32
    %c0_i32_0 = arith.constant 0 : i32
    return %arg0, %c0_i32 : i32, i32
  }
  func.func @transform_1(%arg0: i32) -> (i32, i32) {
    %c0_i32 = arith.constant 0 : i32
    %c0_i32_0 = arith.constant 0 : i32
    return %arg0, %c0_i32 : i32, i32
  }
  func.func @transform_2(%arg0: i32) -> (i32, i32) {
    %c0_i32 = arith.constant 0 : i32
    %c0_i32_0 = arith.constant 0 : i32
    return %arg0, %c0_i32 : i32, i32
  }
  func.func @transform_3(%arg0: i32) -> (i32, i32) {
    %c0_i32 = arith.constant 0 : i32
    %c0_i32_0 = arith.constant 0 : i32
    %c0_i32_1 = arith.constant 0 : i32
    return %c0_i32, %c0_i32_0 : i32, i32
  }
  func.func @transform_4(%arg0: i32) -> (i32, i32) {
    %c0_i32 = arith.constant 0 : i32
    %c0_i32_0 = arith.constant 0 : i32
    %c0_i32_1 = arith.constant 0 : i32
    return %c0_i32, %c0_i32_0 : i32, i32
  }
  func.func @transform_5(%arg0: i32) -> (i32, i32) {
    %c0_i32 = arith.constant 0 : i32
    %c0_i32_0 = arith.constant 0 : i32
    return %arg0, %c0_i32 : i32, i32
  }
}

</mosaic_0001>

<bundles_post_ra>
// kernel: tpu_custom_call.1
= control target key start
LH: loop header
LB: loop body
LE: loop exit
PB: predicated region body
PF: predicated region fallthrough
CT: control target
= control target key end

     0   :  { %10 = vsyncpa [#allocation3], 0  ;;  %s333_s0 = inlined_call_operand.hbm [shape: bf16[16,32], index: 0, kind: input, shape index: {}]   ;;  %s334_s1 = inlined_call_operand.hbm [shape: bf16[16,32], index: 1, kind: input, shape index: {}]   ;;  %s335_s2 = inlined_call_operand.hbm [shape: bf16[16,32], index: 2, kind: input, shape index: {}]   ;;  %s336_s3 = inlined_call_operand.vmem [shape: bf16[1,32], index: 3, kind: input, shape index: {}]   ;;  %s337_s4 = inlined_call_operand.vmem [shape: bf16[1,32], index: 4, kind: input, shape index: {}]   ;;  %s338_s5 = inlined_call_operand.hbm [shape: bf16[16,32], index: 5, kind: output, shape index: {}]  }
   0x1   :  { %11 = vsyncpa [#allocation6], 0 }
   0x2   :  { %12 = vsyncpa [#allocation4], 0  ;;  %s263_s18 = smov [#allocation5]   ;;  %s264_s20 = smov [#allocation2]  }
   0x3   :  { %s30_s19 = sshll.u32 %s263_s18, 4  ;;  %s18_s21 = sshll.u32 %s264_s20, 4  ;;  %s31_s19 = int_to_ptr.vmem [resolvable:$true] %s30_s19  ;;  %s19_s21 = int_to_ptr.vmem [resolvable:$true] %s18_s21 }
   0x4   :  { %s185_s22 = scalar_lea.vmem %s31_s19, 128  ;;  %p190_p1 = scmp.lt.s32.totalorder %s31_s19, %s31_s19 }
   0x5   :  { %p186_p0 = scmp.ne.s32.totalorder %s31_s19, %s185_s22  ;;  %p191_p2 = scmp.lt.s32.totalorder %s185_s22, %s185_s22 }
   0x7   :  { %p192_p3 = por %p191_p2, %p190_p1 }
   0x9   :  { %p193_p4 = pnand %p192_p3, %p186_p0 }
   0xb   :  { %196 = shalt.err (!%p193_p4)
}
   0xc   :  { %s265_s23 = smov 64   ;;  %s266_s24 = smov 4  }
   0xd   :  { %36 = dma.hbm_to_vmem [thread:$0]  %s334_s1, 128, %s31_s19, [#allocation6], %s265_s23, %s265_s23, %s266_s24  }
   0xe   :  { %s205_s27 = scalar_lea.vmem %s19_s21, 128  ;;  %p210_p6 = scmp.lt.s32.totalorder %s19_s21, %s19_s21 }
   0xf   :  { %p206_p5 = scmp.ne.s32.totalorder %s19_s21, %s205_s27  ;;  %p211_p7 = scmp.lt.s32.totalorder %s205_s27, %s205_s27 }
  0x11   :  { %p212_p8 = por %p211_p7, %p210_p6 }
  0x13   :  { %p213_p9 = pnand %p212_p8, %p206_p5 }
  0x15   :  { %216 = shalt.err (!%p213_p9)
}
  0x16   :  { %24 = dma.hbm_to_vmem [thread:$0]  %s333_s0, 128, %s19_s21, [#allocation3], %s265_s23, %s265_s23, %s266_s24  }
  0x17   :  { %s267_s30 = smov [#allocation7]  }
  0x18   :  { %s42_s6 = sshll.u32 %s267_s30, 4  ;;  %s43_s6 = int_to_ptr.vmem [resolvable:$true] %s42_s6 }
  0x19   :  { %s225_s7 = scalar_lea.vmem %s43_s6, 128  ;;  %p230_p11 = scmp.lt.s32.totalorder %s43_s6, %s43_s6 }
  0x1a   :  { %p226_p10 = scmp.ne.s32.totalorder %s43_s6, %s225_s7  ;;  %p231_p12 = scmp.lt.s32.totalorder %s225_s7, %s225_s7 }
  0x1c   :  { %p232_p13 = por %p231_p12, %p230_p11 }
  0x1e   :  { %p233_p0 = pnand %p232_p13, %p226_p10 }
  0x20   :  { %236 = shalt.err (!%p233_p0)
}
  0x21   :  { %48 = dma.hbm_to_vmem [thread:$0]  %s335_s2, 128, %s43_s6, [#allocation6], %s265_s23, %s265_s23, %s266_s24  }
  0x22   :  { %257 = dma.done.wait [#allocation3], 128  }
  0x23   :  { %258 = vsyncadd [#allocation3], 4294967168 }
  0x24   :  { %259 = dma.done.wait [#allocation6], 256  }
  0x25   :  { %260 = vsyncadd [#allocation6], 4294967040  ;;  %v156_v0 = vld [vmem:[#allocation2] sm:$0xff]   ;;  %v160_v1 = vld [vmem:[#allocation5] sm:$0xff]   ;;  %vm80_vm0 = vcmask 261120   ;;  %v109_v30 = vlaneseq  ;;  %vm130_vm1 = vcmask 257024  }
  0x26   :  { %v164_v2 = vld [vmem:[#allocation7] sm:$0xff]   ;;  %v157_v3 = vunpack.c.l.bf16 %v156_v0  ;;  %v161_v4 = vunpack.c.l.bf16 %v160_v1  ;;  %v158_v6 = vunpack.c.h.bf16 %v156_v0  ;;  %v162_v7 = vunpack.c.h.bf16 %v160_v1  ;;  %v78_v33 = vld [vmem:[%s336_s3] sm:$0x1]  ;;  %s268_s11 = smov [#allocation8]  }
  0x27   :  { %v165_v5 = vunpack.c.l.bf16 %v164_v2  ;;  %v166_v8 = vunpack.c.h.bf16 %v164_v2  ;;  %v110_v32 = vshrl.u32 %v109_v30, 7  ;;  %v79_v34 = vld [vmem:[%s337_s4] sm:$0x1]  ;;  %v108_v35 = vunpack.c.l.bf16 %v78_v33  ;;  %s138_s3 = sshll.u32 %s268_s11, 4  ;;  %s139_s3 = int_to_ptr.vmem [resolvable:$true] %s138_s3 }
  0x28   :  { %v70_v9 = vadd.f32 %v161_v4, %v157_v3  ;;  %v71_v10 = vadd.f32 %v162_v7, %v158_v6  ;;  %v115_v37 = vunpack.c.l.bf16 %v79_v34  ;;  %s237_s4 = scalar_lea.vmem %s139_s3, 128  ;;  %p242_p2 = scmp.lt.s32.totalorder %s139_s3, %s139_s3 }
  0x29   :  { %v111_v36 = vsub.s32 0, %v110_v32  ;;  %p238_p1 = scmp.ne.s32.totalorder %s139_s3, %s237_s4  ;;  %p243_p3 = scmp.lt.s32.totalorder %s237_s4, %s237_s4 }
  0x2a   :  { %v76_v11 = vadd.f32 %v165_v5, %v70_v9  ;;  %v77_v12 = vadd.f32 %v166_v8, %v71_v10 }
  0x2b   :  { %v112_v38 = vrot.slane %v108_v35, %v111_v36  ;;  %v119_v41 = vrot.slane %v115_v37, %v111_v36  ;;  %p244_p4 = por %p243_p3, %p242_p2 }
  0x2c   :  { %v81_v13 = vsel %vm80_vm0, %v76_v11, 0.0  ;;  %v84_v14 = vsel %vm80_vm0, %v77_v12, 0.0 }
  0x2d   :  { %82 = vadd.xlane.f32.xlu0 %v81_v13  ;;  %p245_p5 = pnand %p244_p4, %p238_p1 }
  0x31   :  { %85 = vadd.xlane.f32.xlu0 %v84_v14 }
  0xb6   :  { %v83_v15 = vpop.xlane.xlu0 %82 }
  0xb7   :  { %v88_v16 = vmul.f32 0.03125, %v83_v15 }
  0xb9   :  { %v90_v17 = vsub.f32 %v76_v11, %v88_v16 }
  0xba   :  { %v86_v18 = vpop.xlane.xlu0 %85 }
  0xbb   :  { %v89_v19 = vmul.f32 0.03125, %v86_v18  ;;  %v92_v20 = vmul.f32 %v90_v17, %v90_v17 }
  0xbd   :  { %v91_v21 = vsub.f32 %v77_v12, %v89_v19  ;;  %v94_v22 = vsel %vm80_vm0, %v92_v20, 0.0 }
  0xbe   :  { %95 = vadd.xlane.f32.xlu1 %v94_v22 }
  0xbf   :  { %v93_v23 = vmul.f32 %v91_v21, %v91_v21 }
  0xc1   :  { %v97_v24 = vsel %vm80_vm0, %v93_v23, 0.0 }
  0xc2   :  { %98 = vadd.xlane.f32.xlu1 %v97_v24 }
 0x147   :  { %v96_v25 = vpop.xlane.xlu1 %95 }
 0x148   :  { %v100_v26 = vmul.f32 0.03125, %v96_v25 }
 0x14a   :  { %v102_v27 = vadd.f32 1e-12, %v100_v26 }
 0x14b   :  { %v99_v28 = vpop.xlane.xlu1 %98 }
 0x14c   :  { %173 = vrsqrt.f32 %v102_v27  ;;  %v101_v29 = vmul.f32 0.03125, %v99_v28 }
 0x14e   :  { %v103_v31 = vadd.f32 1e-12, %v101_v29 }
 0x150   :  { %175 = vrsqrt.f32 %v103_v31 }
 0x159   :  { %v174_v39 = vpop.eup %173 }
 0x15a   :  { %v106_v40 = vmul.f32 %v174_v39, %v90_v17 }
 0x15c   :  { %v113_v42 = vmul.f32 %v112_v38, %v106_v40 }
 0x15d   :  { %v176_v43 = vpop.eup %175 }
 0x15e   :  { %v107_v44 = vmul.f32 %v176_v43, %v91_v21  ;;  %v120_v45 = vadd.f32 %v119_v41, %v113_v42 }
 0x160   :  { %v114_v46 = vmul.f32 %v112_v38, %v107_v44  ;;  %v153_v47 = vpack.c.bf16 %v120_v45, %v120_v45 }
 0x162   :  { %v121_v48 = vadd.f32 %v119_v41, %v114_v46  ;;  %131 = vst.msk [vmem:[#allocation8] sm:$0xf] %vm130_vm1, %v153_v47 }
 0x164   :  { %v154_v49 = vpack.c.bf16 %v121_v48, %v121_v48 }
 0x166   :  { %132 = vst.msk [vmem:[#allocation8 + $0x4] sm:$0xf] %vm130_vm1, %v154_v49 }
 0x167   :  { %248 = shalt.err (!%p245_p5)
}
 0x168   :  { %144 = dma.vmem_to_hbm [thread:$0]  %s139_s3, 128, %s338_s5, [#allocation4], %s265_s23, %s265_s23, %s266_s24  }
 0x169   :  { %261 = dma.done.wait [#allocation4], 128  }
 0x16a   :  { %262 = vsyncadd [#allocation4], 4294967168 }
 0x16b   :  { %148 = vsyncpa [#allocation3], 1 }
 0x16c   :  { %149 = vsyncpa [#allocation6], 1 }
 0x16d   :  { %150 = vsyncpa [#allocation4], 1 }

</bundles_post_ra>
